<compile_context>
chip_gen: v7x
topology: tpu7x:2x2x1
jax: 0.10.0
libtpu: 0.0.40
codegen_flags: <defaults>
</compile_context>

<pallas_src>
import functools

import jax
import jax.numpy as jnp
from jax.experimental import pallas as pl
from jax.experimental.pallas import tpu as pltpu


def _round_up(x, m):
    return ((x + m - 1) // m) * m


def _policy_loss_kernel(fused_ref, w1_ref, b1_ref, w2_ref, b2_ref, loss_ref,
                        *, entropy_penalty, state_dim, bz, tm, needs_mask):
    # ----- unpack the fused bf16 stream: [state | advantage | action | pad] --
    fused = fused_ref[...]                                            # (tm, Wf) bf16
    x = fused[:, :state_dim].astype(jnp.float32)                      # (tm, S)
    adv = fused[:, state_dim:state_dim + 1].astype(jnp.float32)       # (tm, 1)
    act = (fused[:, state_dim + 1:state_dim + 2]
           .astype(jnp.float32).astype(jnp.int32))                    # (tm, 1), exact

    # ----- MLP: linear1 -> ReLU -> linear2 (f32 compute, MXU f32 accumulate) -
    h = jnp.dot(x, w1_ref[...], preferred_element_type=jnp.float32) + b1_ref[...]
    h = jnp.maximum(h, 0.0)                                            # (tm, H)
    logits = (jnp.dot(h, w2_ref[...], preferred_element_type=jnp.float32)
              + b2_ref[...])                                           # (tm, A)

    # ----- log-prob of the chosen action via log-sum-exp ---------------------
    m = jnp.max(logits, axis=1, keepdims=True)
    lse = m + jnp.log(jnp.sum(jnp.exp(logits - m), axis=1, keepdims=True))
    act_iota = jax.lax.broadcasted_iota(jnp.int32, logits.shape, 1)
    sel_logit = jnp.sum(jnp.where(act_iota == act, logits, 0.0),
                        axis=1, keepdims=True)                         # (tm, 1)
    log_p = sel_logit - lse                                            # (tm, 1)

    # ----- per-row loss: -log_p * advantage (+ entropy-penalty term) ---------
    contrib = -log_p * adv
    if entropy_penalty is not None:
        # PyTorch PolicyNet: loss += -(-(p*log p).sum()) * penalty, where p is
        # the *gathered* (selected-action) prob == (p*log p).sum() * penalty.
        contrib = contrib + (jnp.exp(log_p) * log_p) * entropy_penalty

    if needs_mask:  # zero out rows added by batch padding
        row = (jax.lax.broadcasted_iota(jnp.int32, (tm, 1), 0)
               + pl.program_id(0) * tm)
        contrib = jnp.where(row < bz, contrib, 0.0)

    # per-tile partial loss -> this grid step's (1, 1, 1) output block
    loss_ref[...] = jnp.sum(contrib, axis=0, keepdims=True).reshape(1, 1, 1)


def policy_net_loss(state, action, advantage, params, entropy_penalty):
    """state: (bz, S) f32; action: (bz,) i32; advantage: (bz,) f32 -> scalar f32."""
    w1, b1, w2, b2 = params
    bz, state_dim = state.shape
    hidden_dim = w1.shape[1]
    n_action = w2.shape[1]

    # Action is carried as a bf16 *value* inside the fused stream; exact only
    # for indices < 256 (plenty for discrete-action A2C heads).
    assert n_action <= 256, "n_action > 256: pass action as a separate int32 stream"
    # TODO(synk): for n_action > 256, add a separate int32 action input instead.

    # ----- batch tiling -------------------------------------------------------
    # Large tiles amortize the ~0.35us per-grid-step overhead; for non-tiny
    # batches aim for >= 2 tiles so v7x's two TensorCores both get work under
    # the "parallel" batch axis.  tm is a multiple of 32 (bf16-safe sublanes).
    TM_CAP = 4096
    tm_single = _round_up(bz, 32)
    if tm_single <= 64:
        tm = tm_single                                   # tiny batch: one tile
    else:
        tm = min(TM_CAP, _round_up((bz + 1) // 2, 32))   # >= 2 tiles, capped
    padded_bz = _round_up(bz, tm)
    grid_g = padded_bz // tm
    needs_mask = padded_bz != bz

    # ----- fuse state + advantage + action into ONE bf16 stream --------------
    fused_w = _round_up(state_dim + 2, 8)
    cols = jnp.concatenate(
        [state.astype(jnp.float32),
         advantage.reshape(bz, 1).astype(jnp.float32),
         action.reshape(bz, 1).astype(jnp.float32)],     # small ints, exact in bf16
        axis=1)
    fused = jnp.pad(cols, ((0, padded_bz - bz), (0, fused_w - (state_dim + 2))))
    fused = fused.astype(jnp.bfloat16)

    # Weights/biases: f32, resident across the whole grid (constant index maps).
    w1 = w1.astype(jnp.float32)
    w2 = w2.astype(jnp.float32)
    b1_2d = b1.reshape(1, hidden_dim).astype(jnp.float32)
    b2_2d = b2.reshape(1, n_action).astype(jnp.float32)

    kernel = functools.partial(_policy_loss_kernel,
                               entropy_penalty=entropy_penalty,
                               state_dim=state_dim,
                               bz=bz, tm=tm, needs_mask=needs_mask)

    flops = 2 * padded_bz * (state_dim * hidden_dim + hidden_dim * n_action)
    bytes_accessed = (2 * fused.size            # bf16 stream
                      + 4 * (w1.size + b1_2d.size + w2.size + b2_2d.size)
                      + 4 * grid_g)
    cost = pl.CostEstimate(flops=flops,
                           transcendentals=padded_bz * (n_action + 2),
                           bytes_accessed=bytes_accessed)

    partials = pl.pallas_call(
        kernel,
        out_shape=jax.ShapeDtypeStruct((grid_g, 1, 1), jnp.float32),
        grid=(grid_g,),
        in_specs=[
            pl.BlockSpec((tm, fused_w), lambda i: (i, 0)),            # fused stream
            pl.BlockSpec((state_dim, hidden_dim), lambda i: (0, 0)),  # w1 (resident)
            pl.BlockSpec((1, hidden_dim), lambda i: (0, 0)),          # b1 (resident)
            pl.BlockSpec((hidden_dim, n_action), lambda i: (0, 0)),   # w2 (resident)
            pl.BlockSpec((1, n_action), lambda i: (0, 0)),            # b2 (resident)
        ],
        out_specs=pl.BlockSpec((1, 1, 1), lambda i: (i, 0, 0)),
        compiler_params=pltpu.CompilerParams(
            dimension_semantics=("parallel",),
            vmem_limit_bytes=48 * 1024 * 1024),
        cost_estimate=cost,
    )(fused, w1, b1_2d, w2, b2_2d)

    # Tiny (G,) reduction of per-tile partial losses in plain XLA.
    return jnp.sum(partials)


def init_params(key, state_dim, hidden_dim, n_action):
    """Deterministic init; weights stored as (in, out) — transposed vs. PyTorch."""
    k1, k2, k3, k4 = jax.random.split(key, 4)
    s1 = 1.0 / jnp.sqrt(state_dim)
    s2 = 1.0 / jnp.sqrt(hidden_dim)
    w1 = jax.random.uniform(k1, (state_dim, hidden_dim), jnp.float32, -s1, s1)
    b1 = jax.random.uniform(k2, (hidden_dim,), jnp.float32, -s1, s1)
    w2 = jax.random.uniform(k3, (hidden_dim, n_action), jnp.float32, -s2, s2)
    b2 = jax.random.uniform(k4, (n_action,), jnp.float32, -s2, s2)
    return w1, b1, w2, b2


def _reference_loss(state, action, advantage, params, entropy_penalty):
    """Pure-f32 reference (matches the PyTorch module); also returns the L1
    mass of the summands for a principled bf16-input tolerance."""
    w1, b1, w2, b2 = params
    h = jnp.maximum(state @ w1 + b1, 0.0)
    prob_full = jax.nn.softmax(h @ w2 + b2, axis=1)
    p = jnp.take_along_axis(prob_full, action[:, None], axis=1)[:, 0]
    log_p = jnp.log(p)
    terms = -log_p * advantage
    loss = jnp.sum(terms)
    scale = jnp.sum(jnp.abs(terms))
    if entropy_penalty is not None:
        ent_terms = (p * log_p) * entropy_penalty
        loss = loss + jnp.sum(ent_terms)
        scale = scale + jnp.sum(jnp.abs(ent_terms))
    return loss, scale


if __name__ == "__main__":
    STATE_DIM = 4
    N_ACTION = 2
    HIDDEN_DIM = 32
    ENTROPY_PENALTY = 0.01
    BZ = 8

    key = jax.random.PRNGKey(0)
    kp, ks, ka, kv = jax.random.split(key, 4)

    params = init_params(kp, STATE_DIM, HIDDEN_DIM, N_ACTION)
    state = jax.random.normal(ks, (BZ, STATE_DIM), jnp.float32)
    action = jax.random.randint(ka, (BZ,), 0, N_ACTION, dtype=jnp.int32)
    advantage = jax.random.normal(kv, (BZ,), jnp.float32)

    loss = policy_net_loss(state, action, advantage, params, ENTROPY_PENALTY)
    loss = jax.block_until_ready(loss)

    ref, scale = _reference_loss(state, action, advantage, params, ENTROPY_PENALTY)
    # bf16 is only used for the streamed inputs (state/advantage/action); all
    # compute stays f32, so error is a small fraction of the summand L1 mass.
    tol = 3e-2 * float(scale) + 1e-3
    assert abs(float(loss) - float(ref)) <= tol, (float(loss), float(ref), tol)

    print("KERNEL_OK")
</pallas_src>

<mosaic_0001>
module attributes {stable_mosaic.version = 11 : i64} {
  func.func @_policy_loss_kernel(%arg0: i32, %arg1: memref<32x8xbf16, #tpu.memory_space<vmem>>, %arg2: memref<4x32xf32, #tpu.memory_space<vmem>>, %arg3: memref<1x32xf32, #tpu.memory_space<vmem>>, %arg4: memref<32x2xf32, #tpu.memory_space<vmem>>, %arg5: memref<1x2xf32, #tpu.memory_space<vmem>>, %arg6: memref<1x1x1xf32, #tpu.memory_space<vmem>>) attributes {dimension_semantics = [#tpu.dimension_semantics<parallel>], iteration_bounds = array<i64: 1>, scalar_prefetch = 0 : i64, scratch_operands = 0 : i64, tpu.core_type = #tpu.core_type<tc>, window_params = [{transform_indices = @transform_0, window_bounds = array<i64: 32, 8>}, {pipeline_mode = #tpu.pipeline_mode<synchronous>, transform_indices = @transform_1, window_bounds = array<i64: 4, 32>}, {pipeline_mode = #tpu.pipeline_mode<synchronous>, transform_indices = @transform_2, window_bounds = array<i64: 1, 32>}, {pipeline_mode = #tpu.pipeline_mode<synchronous>, transform_indices = @transform_3, window_bounds = array<i64: 32, 2>}, {pipeline_mode = #tpu.pipeline_mode<synchronous>, transform_indices = @transform_4, window_bounds = array<i64: 1, 2>}, {transform_indices = @transform_5, window_bounds = array<i64: 1, 1, 1>}]} {
    %c0 = arith.constant 0 : index
    %c0_0 = arith.constant 0 : index
    %0 = vector.load %arg1[%c0, %c0_0] : memref<32x8xbf16, #tpu.memory_space<vmem>>, vector<32x8xbf16>
    %1 = vector.extract_strided_slice %0 {offsets = [0, 0], sizes = [32, 4], strides = [1, 1]} : vector<32x8xbf16> to vector<32x4xbf16>
    %2 = arith.extf %1 : vector<32x4xbf16> to vector<32x4xf32>
    %3 = vector.extract_strided_slice %0 {offsets = [0, 4], sizes = [32, 1], strides = [1, 1]} : vector<32x8xbf16> to vector<32x1xbf16>
    %4 = arith.extf %3 : vector<32x1xbf16> to vector<32x1xf32>
    %5 = vector.extract_strided_slice %0 {offsets = [0, 5], sizes = [32, 1], strides = [1, 1]} : vector<32x8xbf16> to vector<32x1xbf16>
    %6 = arith.extf %5 : vector<32x1xbf16> to vector<32x1xf32>
    %7 = arith.fptosi %6 : vector<32x1xf32> to vector<32x1xi32>
    %c0_1 = arith.constant 0 : index
    %c0_2 = arith.constant 0 : index
    %8 = vector.load %arg2[%c0_1, %c0_2] : memref<4x32xf32, #tpu.memory_space<vmem>>, vector<4x32xf32>
    %cst = arith.constant dense<0.000000e+00> : vector<32x32xf32>
    %9 = tpu.matmul %2, %8, %cst {dimension_numbers = #tpu.dot_dimension_numbers<[1], [0], [0], [1], [0, 0, 1, 1], [], []>} : vector<32x4xf32>, vector<4x32xf32>, vector<32x32xf32> -> vector<32x32xf32>
    %c0_3 = arith.constant 0 : index
    %c0_4 = arith.constant 0 : index
    %10 = vector.load %arg3[%c0_3, %c0_4] : memref<1x32xf32, #tpu.memory_space<vmem>>, vector<1x32xf32>
    %11 = vector.broadcast %10 : vector<1x32xf32> to vector<32x32xf32>
    %12 = arith.addf %9, %11 : vector<32x32xf32>
    %cst_5 = arith.constant 0.000000e+00 : f32
    %13 = vector.broadcast %cst_5 : f32 to vector<32x32xf32>
    %14 = arith.maximumf %12, %13 : vector<32x32xf32>
    %c0_6 = arith.constant 0 : index
    %c0_7 = arith.constant 0 : index
    %15 = vector.load %arg4[%c0_6, %c0_7] : memref<32x2xf32, #tpu.memory_space<vmem>>, vector<32x2xf32>
    %cst_8 = arith.constant dense<0.000000e+00> : vector<32x2xf32>
    %16 = tpu.matmul %14, %15, %cst_8 {dimension_numbers = #tpu.dot_dimension_numbers<[1], [0], [0], [1], [0, 0, 1, 1], [], []>} : vector<32x32xf32>, vector<32x2xf32>, vector<32x2xf32> -> vector<32x2xf32>
    %c0_9 = arith.constant 0 : index
    %c0_10 = arith.constant 0 : index
    %17 = vector.load %arg5[%c0_9, %c0_10] : memref<1x2xf32, #tpu.memory_space<vmem>>, vector<1x2xf32>
    %18 = vector.broadcast %17 : vector<1x2xf32> to vector<32x2xf32>
    %19 = arith.addf %16, %18 : vector<32x2xf32>
    %cst_11 = arith.constant dense<0xFF800000> : vector<32xf32>
    %20 = vector.multi_reduction <maximumf>, %19, %cst_11 [1] : vector<32x2xf32> to vector<32xf32>
    %21 = vector.shape_cast %20 : vector<32xf32> to vector<32x1xf32>
    %22 = vector.broadcast %21 : vector<32x1xf32> to vector<32x2xf32>
    %23 = arith.subf %19, %22 : vector<32x2xf32>
    %24 = math.exp %23 : vector<32x2xf32>
    %cst_12 = arith.constant dense<0.000000e+00> : vector<32xf32>
    %25 = vector.multi_reduction <add>, %24, %cst_12 [1] : vector<32x2xf32> to vector<32xf32>
    %26 = vector.shape_cast %25 : vector<32xf32> to vector<32x1xf32>
    %27 = math.log %26 : vector<32x1xf32>
    %28 = arith.addf %21, %27 : vector<32x1xf32>
    %29 = tpu.iota {dimensions = array<i32: 1>} : vector<32x2xi32>
    %30 = vector.broadcast %7 : vector<32x1xi32> to vector<32x2xi32>
    %31 = arith.cmpi eq, %29, %30 : vector<32x2xi32>
    %cst_13 = arith.constant 0.000000e+00 : f32
    %32 = vector.broadcast %cst_13 : f32 to vector<32x2xf32>
    %33 = arith.select %31, %19, %32 : vector<32x2xi1>, vector<32x2xf32>
    %cst_14 = arith.constant dense<0.000000e+00> : vector<32xf32>
    %34 = vector.multi_reduction <add>, %33, %cst_14 [1] : vector<32x2xf32> to vector<32xf32>
    %35 = vector.shape_cast %34 : vector<32xf32> to vector<32x1xf32>
    %36 = arith.subf %35, %28 : vector<32x1xf32>
    %cst_15 = arith.constant 0.000000e+00 : f32
    %37 = vector.broadcast %cst_15 : f32 to vector<32x1xf32>
    %38 = arith.subf %37, %36 : vector<32x1xf32>
    %39 = arith.mulf %38, %4 : vector<32x1xf32>
    %40 = math.exp %36 : vector<32x1xf32>
    %41 = arith.mulf %40, %36 : vector<32x1xf32>
    %cst_16 = arith.constant 0.00999999977 : f32
    %42 = vector.broadcast %cst_16 : f32 to vector<32x1xf32>
    %43 = arith.mulf %41, %42 : vector<32x1xf32>
    %44 = arith.addf %39, %43 : vector<32x1xf32>
    %45 = tpu.iota {dimensions = array<i32: 0>} : vector<32x1xi32>
    %c32_i32 = arith.constant 32 : i32
    %46 = arith.muli %arg0, %c32_i32 : i32
    %47 = vector.broadcast %46 : i32 to vector<32x1xi32>
    %48 = arith.addi %45, %47 : vector<32x1xi32>
    %c8_i32 = arith.constant 8 : i32
    %49 = vector.broadcast %c8_i32 : i32 to vector<32x1xi32>
    %50 = arith.cmpi slt, %48, %49 : vector<32x1xi32>
    %cst_17 = arith.constant 0.000000e+00 : f32
    %51 = vector.broadcast %cst_17 : f32 to vector<32x1xf32>
    %52 = arith.select %50, %44, %51 : vector<32x1xi1>, vector<32x1xf32>
    %cst_18 = arith.constant dense<0.000000e+00> : vector<1xf32>
    %53 = vector.multi_reduction <add>, %52, %cst_18 [0] : vector<32x1xf32> to vector<1xf32>
    %54 = vector.shape_cast %53 : vector<1xf32> to vector<1x1xf32>
    %55 = vector.shape_cast %54 : vector<1x1xf32> to vector<1x1x1xf32>
    %c0_19 = arith.constant 0 : index
    %c0_20 = arith.constant 0 : index
    %c0_21 = arith.constant 0 : index
    %56 = vector.load %arg6[%c0_19, %c0_20, %c0_21] : memref<1x1x1xf32, #tpu.memory_space<vmem>>, vector<1x1x1xf32>
    tpu.vector_store %arg6[%c0_19, %c0_20, %c0_21], %55 {strides = array<i32>} : memref<1x1x1xf32, #tpu.memory_space<vmem>>, vector<1x1x1xf32>,
    return
  }
  func.func @transform_0(%arg0: i32) -> (i32, i32) {
    %c0_i32 = arith.constant 0 : i32
    %c0_i32_0 = arith.constant 0 : i32
    return %arg0, %c0_i32 : i32, i32
  }
  func.func @transform_1(%arg0: i32) -> (i32, i32) {
    %c0_i32 = arith.constant 0 : i32
    %c0_i32_0 = arith.constant 0 : i32
    %c0_i32_1 = arith.constant 0 : i32
    return %c0_i32, %c0_i32_0 : i32, i32
  }
  func.func @transform_2(%arg0: i32) -> (i32, i32) {
    %c0_i32 = arith.constant 0 : i32
    %c0_i32_0 = arith.constant 0 : i32
    %c0_i32_1 = arith.constant 0 : i32
    return %c0_i32, %c0_i32_0 : i32, i32
  }
  func.func @transform_3(%arg0: i32) -> (i32, i32) {
    %c0_i32 = arith.constant 0 : i32
    %c0_i32_0 = arith.constant 0 : i32
    %c0_i32_1 = arith.constant 0 : i32
    return %c0_i32, %c0_i32_0 : i32, i32
  }
  func.func @transform_4(%arg0: i32) -> (i32, i32) {
    %c0_i32 = arith.constant 0 : i32
    %c0_i32_0 = arith.constant 0 : i32
    %c0_i32_1 = arith.constant 0 : i32
    return %c0_i32, %c0_i32_0 : i32, i32
  }
  func.func @transform_5(%arg0: i32) -> (i32, i32, i32) {
    %c0_i32 = arith.constant 0 : i32
    %c0_i32_0 = arith.constant 0 : i32
    %c0_i32_1 = arith.constant 0 : i32
    return %arg0, %c0_i32, %c0_i32_0 : i32, i32, i32
  }
}

</mosaic_0001>

<bundles_post_ra>
// kernel: tpu_custom_call.1
= control target key start
LH: loop header
LB: loop body
LE: loop exit
PB: predicated region body
PF: predicated region fallthrough
CT: control target
= control target key end

     0   :  { %vm54_vm0 = vcmask 1043456   ;;  %vm41_vm1 = vcmask 31744   ;;  %s611_s0 = inlined_call_operand.vmem [shape: bf16[32,8], index: 0, kind: input, shape index: {}]   ;;  %s612_s1 = inlined_call_operand.vmem [shape: f32[4,32], index: 1, kind: input, shape index: {}]   ;;  %s613_s2 = inlined_call_operand.vmem [shape: f32[1,32], index: 2, kind: input, shape index: {}]   ;;  %s614_s3 = inlined_call_operand.vmem [shape: f32[32,2], index: 3, kind: input, shape index: {}]   ;;  %s615_s4 = inlined_call_operand.vmem [shape: f32[1,2], index: 4, kind: input, shape index: {}]   ;;  %s616_s5 = inlined_call_operand.hbm [shape: f32[1,1,1], index: 5, kind: output, shape index: {}]  }
   0x1   :  { %v33_v0 = vld [vmem:[%s612_s1] sm:$0xf]  ;;  %v148_v5 = vld [vmem:[%s614_s3 + $0x8] sm:$0xff] }
   0x2   :  { %v436_v1 = vld [vmem:[%s611_s0] sm:$0xff]   ;;  %457 = vmatprep.subr.msk.mxu0 %vm54_vm0, %v33_v0  ;;  %v443_v6 = vld [vmem:[%s611_s0 + $0x8] sm:$0xff]  }
   0x3   :  { %v147_v2 = vld [vmem:[%s614_s3] sm:$0xff]  ;;  %v569_v3 = vunpack.c.l.bf16 %v436_v1  ;;  %v438_v4 = vunpack.c.h.bf16 %v436_v1 }
   0x4   :  { %10 = vsyncpa [#allocation3], 0  ;;  %458 = vmatpush3.msk.msra.mxu0 %vm54_vm0, %v33_v0  ;;  %v479_v7 = vpack.c.bf16 %v148_v5, %v147_v2  ;;  %v441_v8 = vunpack.c.l.bf16 %v443_v6  ;;  %v442_v9 = vunpack.c.h.bf16 %v443_v6  ;;  %v149_v10 = vld [vmem:[%s614_s3 + $0x10] sm:$0xff]  ;;  %v150_v11 = vld [vmem:[%s614_s3 + $0x18] sm:$0xff]  ;;  %vm158_vm2 = vcmask 261120   ;;  %s529_s7 = smov [#allocation2]  }
   0x5   :  { %459 = vmatprep.mubr.msk.f32.mxu0 %vm41_vm1, %v569_v3  ;;  %v483_v12 = vpack.c.bf16 %v150_v11, %v149_v10  ;;  %v424_v13 = vld [vmem:[%s613_s2] ss:$0 sm:$0xff]  ;;  %v527_v26 = vmov 5   ;;  %vm256_vm3 = vcmask 15360   ;;  %v491_v32 = vtrunc.f32 %v569_v3  ;;  %s416_s8 = sshll.u32 %s529_s7, 4  ;;  %s417_s8 = int_to_ptr.vmem [resolvable:$true] %s416_s8 }
   0x6   :  { %460 = vmatmul.mubr.msk.f32.vlgmr.msra.gmra.mrb[0].mxu0 %vm41_vm1, %v438_v4  ;;  %480 = vmatprep.subr.bf16.mxu0 %v479_v7  ;;  %v430_v27 = vld [vmem:[%s615_s4] ss:$0 sm:$0xff]  ;;  %v305_v39 = vlaneseq  ;;  %vm390_vm5 = vcmask 39968   ;;  %s528_s4 = smov 124   ;;  %vm408_vm6 = vcmask 0   ;;  %s503_s9 = scalar_lea.vmem %s417_s8, 16 }
   0x7   :  { %462 = vmatprep.mubr.msk.f32.mxu0 %vm41_vm1, %v441_v8  ;;  %482 = vmatpush3.bf16.msra.mxu0 %v479_v7  ;;  %v492_v33 = vcvt.f32.s32 %v491_v32  ;;  %p504_p0 = scmp.ne.s32.totalorder %s417_s8, %s503_s9  ;;  %s507_s10 = scalar_lea.vmem %s417_s8, 32 }
   0x8   :  { %487 = vmatprep.subr.bf16.mxu1 %v479_v7  ;;  %484 = vmatprep.subr.bf16.mxu0 %v483_v12  ;;  %v306_v40 = vand.u32 127, %v305_v39  ;;  %p508_p1 = scmp.lt.s32.totalorder %s417_s8, %s417_s8  ;;  %p509_p2 = scmp.lt.s32.totalorder %s507_s10, %s503_s9 }
   0x9   :  { %489 = vmatpush3.bf16.msra.mxu1 %v479_v7  ;;  %496 = vset.pattern.permute.xlu0 %v527_v26 }
   0xa   :  { %463 = vmatmul.mubr.msk.f32.gmra.mrb[2].mxu0 %vm41_vm1, %v442_v9  ;;  %488 = vmatprep.subr.bf16.mxu1 %v483_v12  ;;  %p510_p3 = por %p509_p2, %p508_p1 }
   0xb   :  { %486 = vmatpush3.bf16.msra.mxu0 %v483_v12 }
   0xc   :  { %p511_p4 = pnand %p510_p3, %p504_p0 }
   0xd   :  { %490 = vmatpush3.bf16.msra.mxu1 %v483_v12 }
  0xd9   :  { %v461_v14 = vpop.f32.mrb[0].mxu0 }
  0xda   :  { %v130_v15 = vadd.f32 %v461_v14, %v424_v13  ;;  %v124_v16 = vpop.f32.mrb[1].mxu0 }
  0xdb   :  { %v125_v17 = vadd.f32 %v424_v13, %v124_v16 }
  0xdc   :  { %v144_v19 = vmax.f32 %v130_v15, 0.0 }
  0xdd   :  { %v143_v18 = vmax.f32 %v125_v17, 0.0  ;;  %v464_v20 = vpop.f32.mrb[2].mxu0 }
  0xde   :  { %v140_v21 = vadd.f32 %v464_v20, %v424_v13  ;;  %v134_v22 = vpop.f32.mrb[3].mxu0 }
  0xdf   :  { %473 = vmatprep.mubr.msk.f32.mxu0 %vm158_vm2, %v143_v18  ;;  %v135_v23 = vadd.f32 %v424_v13, %v134_v22 }
  0xe0   :  { %474 = vmatmul.mubr.msk.f32.vlgmr.msra.gmra.mrb[4].mxu0 %vm158_vm2, %v144_v19  ;;  %v146_v24 = vmax.f32 %v140_v21, 0.0 }
  0xe1   :  { %v145_v25 = vmax.f32 %v135_v23, 0.0 }
  0xe3   :  { %476 = vmatprep.mubr.msk.f32.mxu1 %vm158_vm2, %v145_v25 }
  0xe4   :  { %477 = vmatmul.mubr.msk.f32.vlgmr.msra.gmra.mrb[0].mxu1 %vm158_vm2, %v146_v24 }
 0x1b3   :  { %v475_v28 = vpop.f32.mrb[4].mxu0 }
 0x1b4   :  { %v237_v29 = vpop.f32.mrb[5].mxu0 }
 0x1b5   :  { %v238_v30 = vadd.f32 %v430_v27, %v237_v29 }
 0x1b7   :  { %v257_v31 = vsel %vm256_vm3, %v238_v30, -inf  ;;  %v478_v34 = vpop.f32.mrb[0].mxu1 }
 0x1b8   :  { %258 = vmax.xlane.f32.xlu0 %v257_v31  ;;  %v247_v35 = vpop.f32.mrb[1].mxu1 }
 0x1ce   :  { %308 = vperm.xlu0 %496, %v492_v33  }
 0x245   :  { %v259_v36 = vpop.xlane.xlu0 %258 }
 0x246   :  { %v269_v37 = vsub.f32 %v238_v30, %v259_v36 }
 0x248   :  { %v273_v38 = vmul.f32 1.442695, %v269_v37 }
 0x24a   :  { %497 = vpow2.f32 %v273_v38 }
 0x24d   :  { %v309_v41 = vpop.permute.xlu0 %308 }
 0x24e   :  { %vm319_vm4 = vcmp.eq.s32.totalorder %v306_v40, %v309_v41 }
 0x24f   :  { %v323_v44 = vsel %vm319_vm4, %v238_v30, 0.0 }
 0x250   :  { %v327_v45 = vsel %vm256_vm3, %v323_v44, 0.0 }
 0x254   :  { %v498_v42 = vpop.eup %497 }
 0x255   :  { %v281_v43 = vsel %vm256_vm3, %v498_v42, 0.0 }
 0x256   :  { %282 = vadd.xlane.f32.xlu1 %v281_v43 }
 0x25a   :  { %328 = vadd.xlane.f32.xlu1 %v327_v45 }
 0x2e3   :  { %v283_v46 = vpop.xlane.xlu1 %282 }
 0x2e4   :  { %499 = vlog2.f32 %v283_v46 }
 0x2e7   :  { %v329_v50 = vpop.xlane.xlu1 %328 }
 0x2ee   :  { %v500_v47 = vpop.eup %499 }
 0x2ef   :  { %v294_v48 = vmul.f32 0.6931472, %v500_v47 }
 0x2f1   :  { %v301_v49 = vadd.f32 %v294_v48, %v259_v36 }
 0x2f3   :  { %v339_v51 = vsub.f32 %v329_v50, %v301_v49 }
 0x2f5   :  { %v351_v52 = vmul.f32 1.442695, %v339_v51  ;;  %v343_v53 = vsub.f32 0.0, %v339_v51 }
 0x2f7   :  { %501 = vpow2.f32 %v351_v52  ;;  %v347_v56 = vmul.f32 %v569_v3, %v343_v53 }
 0x301   :  { %v502_v54 = vpop.eup %501 }
 0x302   :  { %v359_v55 = vmul.f32 %v502_v54, %v339_v51 }
 0x304   :  { %v363_v57 = vmul.f32 0.01, %v359_v55 }
 0x306   :  { %v367_v58 = vadd.f32 %v363_v57, %v347_v56 }
 0x308   :  { %v391_v59 = vsel %vm390_vm5, %v367_v58, 0.0 }
 0x309   :  { %v398_v60 = vrot.slane %v391_v59, 4 }
 0x30b   :  { %v399_v61 = vadd.f32 %v398_v60, %v391_v59 }
 0x30d   :  { %v400_v62 = vrot.slane %v399_v61, 2 }
 0x30f   :  { %v401_v63 = vadd.f32 %v400_v62, %v399_v61 }
 0x311   :  { %v402_v0 = vrot.slane %v401_v63, 1 }
 0x313   :  { %v403_v1 = vadd.f32 %v402_v0, %v401_v63 }
 0x315   :  { %405 = vrot.lane.b32.xlu1 %v403_v1, %s528_s4 }
 0x387   :  { %v406_v2 = vpop.permute.xlu1 %405 }
 0x388   :  { %409 = vst.msk [vmem:[#allocation2] sm:$0x1] %vm408_vm6, %v406_v2 }
 0x389   :  { %514 = shalt.err (!%p511_p4)
}
 0x38a   :  { %s515_s13 = scalar_lea.hbm %s616_s5, 16 }
 0x38b   :  { %p516_p5 = scmp.ne.s32.totalorder %s616_s5, %s515_s13  ;;  %p519_p6 = scmp.lt.u32.totalorder %s515_s13, %s616_s5 }
 0x38d   :  { %p521_p7 = pnand %p519_p6, %p516_p5 }
 0x38f   :  { %524 = shalt.err (!%p521_p7)
}
 0x390   :  { %419 = dma.vmem_to_hbm [thread:$0]  %s417_s8, 16, %s616_s5, [#allocation3]  }
 0x391   :  { %525 = dma.done.wait [#allocation3], 16  }
 0x392   :  { %526 = vsyncadd [#allocation3], 4294967280 }
 0x393   :  { %423 = vsyncpa [#allocation3], 1 }

</bundles_post_ra>
